<compile_context>
chip_gen: v7x
topology: tpu7x:2x2x1
jax: 0.10.0
libtpu: 0.0.40
codegen_flags: <defaults>
</compile_context>

<pallas_src>
import jax
import jax.numpy as jnp
from jax.experimental import pallas as pl
from jax.experimental.pallas import tpu as pltpu


def _dense_relu_kernel(x_ref, w_ref, b_ref, o_ref):
    # x_ref: (tm, tk)   w_ref: (tk, tn)   b_ref: (1, tn) f32   o_ref: (tm, tn) f32
    k = pl.program_id(2)

    @pl.when(k == 0)
    def _():
        o_ref[...] = jnp.zeros_like(o_ref)

    # MXU matmul; f32 accumulation directly into the resident output block.
    o_ref[...] += jnp.dot(x_ref[...], w_ref[...],
                          preferred_element_type=jnp.float32)

    @pl.when(k == pl.num_programs(2) - 1)
    def _():
        y = o_ref[...] + b_ref[...]          # (tm,tn) + (1,tn), f32
        o_ref[...] = jnp.maximum(y, 0.0).astype(o_ref.dtype)


def _round_up(a, b):
    return ((a + b - 1) // b) * b


def _default_tiles_and_vmem():
    """Per-generation tile defaults + scoped-VMEM budget."""
    vmem_cap = 64 * 1024 * 1024
    try:
        info = pltpu.get_tpu_info()
        vmem_cap = int(getattr(info, "vmem_capacity_bytes", vmem_cap))
    except Exception:
        pass
    if vmem_cap >= 100 * 1024 * 1024:
        # v5e / v6e: 128 MiB VMEM -> large tiles to push arithmetic intensity
        # (bf16 1024-tiles use ~16 MiB double-buffered).
        return 1024, 1024, 1024, 100 * 1024 * 1024
    # v7x: 64 MiB physical VMEM; 512 tiles already reach the MXU roofline with
    # its 3.2 TB/s HBM and keep the M/N grid large enough for both TensorCores.
    return 512, 512, 1024, 52 * 1024 * 1024


def dense_with_relu(x, weight, bias, *, tm=None, tn=None, tk=None,
                    compute_dtype=jnp.bfloat16, vmem_limit_bytes=None):
    """y = relu(x @ weight.T + bias), matching nn.Linear + nn.ReLU.

    x:      (M, K)   weight: (N, K) (PyTorch nn.Linear layout)   bias: (N,)
    compute_dtype: bf16 by default (MXU-native inputs, f32 accumulation).
                   Pass None for the exact f32 path (3-6x slower on the MXU).
    """
    M, K = x.shape
    N, K2 = weight.shape
    assert K == K2, (x.shape, weight.shape)
    orig_dtype = x.dtype

    d_tm, d_tn, d_tk, d_vmem = _default_tiles_and_vmem()
    tm = tm or d_tm
    tn = tn or d_tn
    tk = tk or d_tk
    vmem_limit_bytes = vmem_limit_bytes or d_vmem

    if compute_dtype is not None:
        x = x.astype(compute_dtype)
        weight = weight.astype(compute_dtype)
    # One-time (K, N) layout so the kernel RHS needs no per-tile transpose.
    wt = weight.T

    # Sublane alignment for the M edge: 8 rows per f32 vreg, 16 for bf16.
    itemsize = jnp.dtype(x.dtype).itemsize
    m_align = max(8, 32 // itemsize)
    tm_e = min(tm, _round_up(M, m_align))
    tn_e = min(tn, _round_up(N, 128))
    tk_e = min(tk, _round_up(K, 128))

    # Only K is zero-padded: padded-K columns contribute exactly 0 to the dot.
    # M / N edges are left ragged (no extra HBM padding copies).
    Kp = _round_up(K, tk_e)
    if Kp != K:
        x = jnp.pad(x, ((0, 0), (0, Kp - K)))
        wt = jnp.pad(wt, ((0, Kp - K), (0, 0)))
    b2 = bias.astype(jnp.float32).reshape(1, N)

    grid = (pl.cdiv(M, tm_e), pl.cdiv(N, tn_e), Kp // tk_e)

    out = pl.pallas_call(
        _dense_relu_kernel,
        out_shape=jax.ShapeDtypeStruct((M, N), jnp.float32),
        grid_spec=pltpu.PrefetchScalarGridSpec(
            num_scalar_prefetch=0,
            grid=grid,
            in_specs=[
                pl.BlockSpec((tm_e, tk_e), lambda i, j, k: (i, k)),   # x tile
                pl.BlockSpec((tk_e, tn_e), lambda i, j, k: (k, j)),   # w tile (K,N)
                pl.BlockSpec((1, tn_e), lambda i, j, k: (0, j)),      # bias tile
            ],
            out_specs=pl.BlockSpec((tm_e, tn_e), lambda i, j, k: (i, j)),
        ),
        compiler_params=pltpu.CompilerParams(
            # M and N axes shard across TensorCores; K is the carried reduction.
            dimension_semantics=("parallel", "parallel", "arbitrary"),
            vmem_limit_bytes=vmem_limit_bytes,
        ),
    )(x, wt, b2)

    if out.dtype != orig_dtype:
        out = out.astype(orig_dtype)
    return out


if __name__ == "__main__":
    # DummyDenseWithRelu(input_size=32, output_size=64), batch=8.
    # NOTE: at this toy size a plain XLA fusion would win on launch overhead;
    # the Pallas path is exercised here deliberately for correctness testing.
    input_size = 32
    output_size = 64
    batch = 8

    key = jax.random.PRNGKey(0)
    kx, kw, kb = jax.random.split(key, 3)

    x = jax.random.normal(kx, (batch, input_size), dtype=jnp.float32)
    # Deterministic init mimicking nn.Linear's uniform(-1/sqrt(in), 1/sqrt(in))
    bound = 1.0 / (input_size ** 0.5)
    weight = jax.random.uniform(
        kw, (output_size, input_size), minval=-bound, maxval=bound,
        dtype=jnp.float32)
    bias = jax.random.uniform(
        kb, (output_size,), minval=-bound, maxval=bound, dtype=jnp.float32)

    # Default (bf16 MXU-native) path and the exact f32 opt-in path.
    y_bf16 = jax.block_until_ready(dense_with_relu(x, weight, bias))
    y_f32 = jax.block_until_ready(
        dense_with_relu(x, weight, bias, compute_dtype=None))

    # References (computed at highest precision so the ref itself is f32-exact).
    y_ref = jnp.maximum(
        jnp.dot(x, weight.T, precision=jax.lax.Precision.HIGHEST) + bias, 0.0)
    xb = x.astype(jnp.bfloat16).astype(jnp.float32)
    wb = weight.astype(jnp.bfloat16).astype(jnp.float32)
    y_ref_bf16 = jnp.maximum(
        jnp.dot(xb, wb.T, precision=jax.lax.Precision.HIGHEST) + bias, 0.0)

    assert y_bf16.shape == (batch, output_size)
    assert y_f32.shape == (batch, output_size)
    # f32 path: near-exact (MXU f32 emulation) against the f32 reference.
    assert jnp.allclose(y_f32, y_ref, atol=2e-4, rtol=2e-4)
    # bf16 path: matches a bf16-input reference tightly (f32 accumulation)...
    assert jnp.allclose(y_bf16, y_ref_bf16, atol=1e-4, rtol=1e-4)
    # ...and the true f32 reference within bf16 input-rounding error.
    assert jnp.allclose(y_bf16, y_ref, atol=5e-2, rtol=5e-2)

    print("KERNEL_OK")
</pallas_src>

<mosaic_0001>
module attributes {stable_mosaic.version = 11 : i64} {
  func.func @_dense_relu_kernel(%arg0: i32, %arg1: i32, %arg2: i32, %arg3: memref<16x128xbf16, #tpu.memory_space<vmem>>, %arg4: memref<128x128xbf16, #tpu.memory_space<vmem>>, %arg5: memref<1x128xf32, #tpu.memory_space<vmem>>, %arg6: memref<16x128xf32, #tpu.memory_space<vmem>>) attributes {dimension_semantics = [#tpu.dimension_semantics<parallel>, #tpu.dimension_semantics<parallel>, #tpu.dimension_semantics<arbitrary>], iteration_bounds = array<i64: 1, 1, 1>, scalar_prefetch = 0 : i64, scratch_operands = 0 : i64, tpu.core_type = #tpu.core_type<tc>, window_params = [{transform_indices = @transform_0, window_bounds = array<i64: 16, 128>}, {transform_indices = @transform_1, window_bounds = array<i64: 128, 128>}, {transform_indices = @transform_2, window_bounds = array<i64: 1, 128>}, {transform_indices = @transform_3, window_bounds = array<i64: 16, 128>}]} {
    %c0_i32 = arith.constant 0 : i32
    %0 = arith.cmpi eq, %arg2, %c0_i32 : i32
    %1 = arith.extui %0 : i1 to i32
    %c0_i32_0 = arith.constant 0 : i32
    %2 = arith.cmpi ne, %1, %c0_i32_0 : i32
    scf.if %2 {
      %cst_10 = arith.constant 0.000000e+00 : f32
      %12 = vector.broadcast %cst_10 : f32 to vector<16x128xf32>
      %c0_11 = arith.constant 0 : index
      %c0_12 = arith.constant 0 : index
      %13 = vector.load %arg6[%c0_11, %c0_12] : memref<16x128xf32, #tpu.memory_space<vmem>>, vector<16x128xf32>
      tpu.vector_store %arg6[%c0_11, %c0_12], %12 {strides = array<i32>} : memref<16x128xf32, #tpu.memory_space<vmem>>, vector<16x128xf32>,
    } else {
    }
    %c0 = arith.constant 0 : index
    %c0_1 = arith.constant 0 : index
    %3 = vector.load %arg6[%c0, %c0_1] : memref<16x128xf32, #tpu.memory_space<vmem>>, vector<16x128xf32>
    %c0_2 = arith.constant 0 : index
    %c0_3 = arith.constant 0 : index
    %4 = vector.load %arg3[%c0_2, %c0_3] : memref<16x128xbf16, #tpu.memory_space<vmem>>, vector<16x128xbf16>
    %c0_4 = arith.constant 0 : index
    %c0_5 = arith.constant 0 : index
    %5 = vector.load %arg4[%c0_4, %c0_5] : memref<128x128xbf16, #tpu.memory_space<vmem>>, vector<128x128xbf16>
    %cst = arith.constant dense<0.000000e+00> : vector<16x128xf32>
    %6 = tpu.matmul %4, %5, %cst {dimension_numbers = #tpu.dot_dimension_numbers<[1], [0], [0], [1], [0, 0, 1, 1], [], []>} : vector<16x128xbf16>, vector<128x128xbf16>, vector<16x128xf32> -> vector<16x128xf32>
    %7 = arith.addf %3, %6 : vector<16x128xf32>
    %c0_6 = arith.constant 0 : index
    %c0_7 = arith.constant 0 : index
    %8 = vector.load %arg6[%c0_6, %c0_7] : memref<16x128xf32, #tpu.memory_space<vmem>>, vector<16x128xf32>
    tpu.vector_store %arg6[%c0_6, %c0_7], %7 {strides = array<i32>} : memref<16x128xf32, #tpu.memory_space<vmem>>, vector<16x128xf32>,
    %c0_i32_8 = arith.constant 0 : i32
    %9 = arith.cmpi eq, %arg2, %c0_i32_8 : i32
    %10 = arith.extui %9 : i1 to i32
    %c0_i32_9 = arith.constant 0 : i32
    %11 = arith.cmpi ne, %10, %c0_i32_9 : i32
    scf.if %11 {
      %c0_10 = arith.constant 0 : index
      %c0_11 = arith.constant 0 : index
      %12 = vector.load %arg6[%c0_10, %c0_11] : memref<16x128xf32, #tpu.memory_space<vmem>>, vector<16x128xf32>
      %c0_12 = arith.constant 0 : index
      %c0_13 = arith.constant 0 : index
      %13 = vector.load %arg5[%c0_12, %c0_13] : memref<1x128xf32, #tpu.memory_space<vmem>>, vector<1x128xf32>
      %14 = vector.broadcast %13 : vector<1x128xf32> to vector<16x128xf32>
      %15 = arith.addf %12, %14 : vector<16x128xf32>
      %cst_14 = arith.constant 0.000000e+00 : f32
      %16 = vector.broadcast %cst_14 : f32 to vector<16x128xf32>
      %17 = arith.maximumf %15, %16 : vector<16x128xf32>
      %c0_15 = arith.constant 0 : index
      %c0_16 = arith.constant 0 : index
      %18 = vector.load %arg6[%c0_15, %c0_16] : memref<16x128xf32, #tpu.memory_space<vmem>>, vector<16x128xf32>
      tpu.vector_store %arg6[%c0_15, %c0_16], %17 {strides = array<i32>} : memref<16x128xf32, #tpu.memory_space<vmem>>, vector<16x128xf32>,
    } else {
    }
    return
  }
  func.func @transform_0(%arg0: i32, %arg1: i32, %arg2: i32) -> (i32, i32) {
    %c0_i32 = arith.constant 0 : i32
    return %arg0, %arg2 : i32, i32
  }
  func.func @transform_1(%arg0: i32, %arg1: i32, %arg2: i32) -> (i32, i32) {
    %c0_i32 = arith.constant 0 : i32
    return %arg2, %arg1 : i32, i32
  }
  func.func @transform_2(%arg0: i32, %arg1: i32, %arg2: i32) -> (i32, i32) {
    %c0_i32 = arith.constant 0 : i32
    %c0_i32_0 = arith.constant 0 : i32
    return %c0_i32, %arg1 : i32, i32
  }
  func.func @transform_3(%arg0: i32, %arg1: i32, %arg2: i32) -> (i32, i32) {
    %c0_i32 = arith.constant 0 : i32
    return %arg0, %arg1 : i32, i32
  }
}

</mosaic_0001>

<bundles_post_ra>
// kernel: tpu_custom_call.1
= control target key start
LH: loop header
LB: loop body
LE: loop exit
PB: predicated region body
PF: predicated region fallthrough
CT: control target
= control target key end

     0   :  { %8 = vsyncpa [#allocation3], 0  ;;  %v252_v1 = vmov 0.0   ;;  %vm253_vm0 = vmmov 0   ;;  %s319_s0 = inlined_call_operand.vmem [shape: bf16[8,128], index: 0, kind: input, shape index: {}]   ;;  %s320_s1 = inlined_call_operand.vmem [shape: bf16[128,64], index: 1, kind: input, shape index: {}]   ;;  %s321_s2 = inlined_call_operand.vmem [shape: f32[1,64], index: 2, kind: input, shape index: {}]   ;;  %s322_s3 = inlined_call_operand.hbm [shape: f32[8,64], index: 3, kind: output, shape index: {}]  }
   0x1   :  { %v219_v0 = vld [vmem:[%s320_s1] sm:$0xff]   ;;  %194 = vmatprep.subr.bf16.mxu0 %v252_v1  ;;  %v220_v2 = vld [vmem:[%s320_s1 + $0x8] sm:$0xff]   ;;  %210 = vmatprep.mubr.msk.bf16.mxu0 %vm253_vm0, %v252_v1  ;;  %v221_v3 = vld [vmem:[%s320_s1 + $0x10] sm:$0xff]  }
   0x2   :  { %195 = vmatpush3.bf16.msra.mxu0 %v219_v0  ;;  %v222_v4 = vld [vmem:[%s320_s1 + $0x18] sm:$0xff]   ;;  %v223_v5 = vld [vmem:[%s320_s1 + $0x20] sm:$0xff]   ;;  %v224_v6 = vld [vmem:[%s320_s1 + $0x28] sm:$0xff]  }
   0x3   :  { %196 = vmatprep.subr.bf16.mxu0 %v252_v1  ;;  %v225_v7 = vld [vmem:[%s320_s1 + $0x30] sm:$0xff]   ;;  %v226_v8 = vld [vmem:[%s320_s1 + $0x38] sm:$0xff]   ;;  %v227_v9 = vld [vmem:[%s319_s0] sm:$0xff]  }
   0x4   :  { %v184_v11 = vld [vmem:[%s321_s2] ss:$0 sm:$0xff] }
   0x6   :  { %197 = vmatpush3.bf16.msra.mxu0 %v220_v2 }
   0x7   :  { %198 = vmatprep.subr.bf16.mxu0 %v252_v1 }
   0xa   :  { %199 = vmatpush3.bf16.msra.mxu0 %v221_v3 }
   0xb   :  { %200 = vmatprep.subr.bf16.mxu0 %v252_v1 }
   0xe   :  { %201 = vmatpush3.bf16.msra.mxu0 %v222_v4 }
   0xf   :  { %202 = vmatprep.subr.bf16.mxu0 %v252_v1 }
  0x12   :  { %203 = vmatpush3.bf16.msra.mxu0 %v223_v5 }
  0x13   :  { %204 = vmatprep.subr.bf16.mxu0 %v252_v1 }
  0x16   :  { %205 = vmatpush3.bf16.msra.mxu0 %v224_v6 }
  0x17   :  { %206 = vmatprep.subr.bf16.mxu0 %v252_v1 }
  0x1a   :  { %207 = vmatpush3.bf16.msra.mxu0 %v225_v7 }
  0x1b   :  { %208 = vmatprep.subr.bf16.mxu0 %v252_v1 }
  0x1e   :  { %209 = vmatpush3.bf16.msra.mxu0 %v226_v8 }
  0x21   :  { %211 = vmatmul.mubr.bf16.vlgmr.msra.gmra.mrb[0].mxu0 %v227_v9 }
  0xf4   :  { %v130_v10 = vpop.f32.mrb[0].mxu0 }
  0xf5   :  { %v212_v12 = vpop.f32.mrb[1].mxu0  ;;  %v153_v14 = vadd.f32 %v184_v11, %v130_v10 }
  0xf6   :  { %v133_v13 = vpop.f32.mrb[2].mxu0 }
  0xf7   :  { %v213_v15 = vpop.f32.mrb[3].mxu0  ;;  %v155_v16 = vmax.f32 %v153_v14, 0.0  ;;  %v154_v17 = vadd.f32 %v184_v11, %v133_v13 }
  0xf9   :  { %157 = vst [vmem:[#allocation2] sm:$0xff] %v155_v16  ;;  %v156_v18 = vmax.f32 %v154_v17, 0.0 }
  0xfb   :  { %158 = vst [vmem:[#allocation2 + $0x8] sm:$0xff] %v156_v18 }
  0xfc   :  { %163 = vsyncadd [#allocation3], 128  ;;  %s254_s1 = smov [#allocation2]  }
  0xfd   :  { %s164_s5 = sshll.u32 %s254_s1, 4  ;;  %s165_s5 = int_to_ptr.vmem [resolvable:$true] %s164_s5 }
  0xfe   :  { %s228_s0 = scalar_lea.vmem %s165_s5, 128  ;;  %s232_s6 = scalar_lea.vmem %s165_s5, 256 }
  0xff   :  { %p229_p0 = scmp.ne.s32.totalorder %s165_s5, %s228_s0  ;;  %p233_p1 = scmp.lt.s32.totalorder %s165_s5, %s165_s5 }
 0x100   :  { %p234_p2 = scmp.lt.s32.totalorder %s232_s6, %s228_s0 }
 0x102   :  { %p235_p3 = por %p234_p2, %p233_p1 }
 0x104   :  { %p236_p4 = pnand %p235_p3, %p229_p0 }
 0x106   :  { %239 = shalt.err (!%p236_p4)
}
 0x107   :  { %s240_s8 = scalar_lea.hbm %s322_s3, 128 }
 0x108   :  { %p241_p5 = scmp.ne.s32.totalorder %s322_s3, %s240_s8  ;;  %p244_p6 = scmp.lt.u32.totalorder %s240_s8, %s322_s3 }
 0x10a   :  { %p246_p7 = pnand %p244_p6, %p241_p5 }
 0x10c   :  { %249 = shalt.err (!%p246_p7)
}
 0x10d   :  { %s255_s13 = smov 128   ;;  %s256_s14 = smov 8  }
 0x10e   :  { %170 = dma.vmem_to_hbm [thread:$0]  %s165_s5, 128, %s322_s3, [#allocation3], %s255_s13, %s255_s13, %s256_s14  }
 0x10f   :  { %250 = dma.done.wait [#allocation3], 256  }
 0x110   :  { %251 = vsyncadd [#allocation3], 4294967040 }
 0x111   :  { %174 = vsyncpa [#allocation3], 1 }

</bundles_post_ra>
